<compile_context>
chip_gen: v7x
topology: tpu7x:2x2x1
jax: 0.10.0
libtpu: 0.0.40
codegen_flags: <defaults>
</compile_context>

<pallas_src>
import functools

import jax
import jax.numpy as jnp
import numpy as np
from jax.experimental import pallas as pl
from jax.experimental.pallas import tpu as pltpu

_LN_EPS = 1e-5
_VMEM_LIMIT = 32 * 1024 * 1024  # explicit scoped-VMEM budget (safe on v5e/v6e/v7x)


def _round_up(n, m):
    return ((n + m - 1) // m) * m


def _layer_norm(y, gamma, beta):
    """PyTorch-semantics LayerNorm over the last axis (f32 math)."""
    mu = jnp.mean(y, axis=-1, keepdims=True)
    var = jnp.mean((y - mu) ** 2, axis=-1, keepdims=True)
    return (y - mu) * jax.lax.rsqrt(var + _LN_EPS) * gamma + beta


# ----------------------------------------------------------------------------
# Pallas kernels
# ----------------------------------------------------------------------------
def fused_mha_block_kernel(xq_ref, xkv_ref, wq_ref, bq_ref, wkv_ref, bkv_ref,
                           wo_ref, bo_ref, g_ref, b_ref, o_ref, *, nhead):
    """One (batch, T-tile) step: MHA + out-proj + residual + LayerNorm in VMEM.

    Matmuls run bf16 x bf16 on the MXU with f32 accumulation; softmax and
    LayerNorm element-wise math stays f32 (v5e VPU/EUP has no bf16).
    """
    xq = xq_ref[0]                               # (Tt, D) f32 (kept for residual)
    xkv = xkv_ref[0]                             # (S,  D) f32
    D = xq.shape[-1]
    hd = D // nhead

    xq_b = xq.astype(jnp.bfloat16)
    xkv_b = xkv.astype(jnp.bfloat16)

    # Projections (softmax 1/sqrt(hd) scale already folded into wq / bq).
    q = jnp.dot(xq_b, wq_ref[...], preferred_element_type=jnp.float32) + bq_ref[...]
    kv = jnp.dot(xkv_b, wkv_ref[...], preferred_element_type=jnp.float32) + bkv_ref[...]
    q = q.astype(jnp.bfloat16)
    k = kv[:, :D].astype(jnp.bfloat16)
    v = kv[:, D:].astype(jnp.bfloat16)

    # Per-head attention; head outputs stay in registers and are merged with a
    # single full-width concatenate (no per-head masked column-slice stores).
    # TODO(synk): pack multiple heads per MXU pass (hd < 128/256 underfills the
    #             systolic array) and add an S-block online-softmax inner loop
    #             for very long memory sequences.
    heads = []
    for h in range(nhead):
        sl = slice(h * hd, (h + 1) * hd)
        s = jnp.einsum("td,sd->ts", q[:, sl], k[:, sl],
                       preferred_element_type=jnp.float32)        # (Tt, S) f32
        m = jnp.max(s, axis=-1, keepdims=True)
        p = jnp.exp(s - m)
        denom = jnp.sum(p, axis=-1, keepdims=True)
        oh = jnp.dot(p.astype(jnp.bfloat16), v[:, sl],
                     preferred_element_type=jnp.float32)          # (Tt, hd) f32
        # Normalize AFTER the PV matmul: scales Tt*hd elements, not Tt*S,
        # and the reciprocal runs on the EUP slot.
        heads.append(oh * pl.reciprocal(denom, approx=True))
    attn = jnp.concatenate(heads, axis=-1)                        # (Tt, D) f32

    out = jnp.dot(attn.astype(jnp.bfloat16), wo_ref[...],
                  preferred_element_type=jnp.float32) + bo_ref[...]
    y = xq + out                                                  # residual in f32
    o_ref[0] = _layer_norm(y, g_ref[...], b_ref[...]).astype(o_ref.dtype)


def fused_ffn_block_kernel(x_ref, w1_ref, b1_ref, w2_ref, b2_ref,
                           g_ref, b_ref, o_ref, acc_ref):
    """(row-tile, ff-tile) step: linear1 + ReLU + partial linear2 accumulated
    into an f32 VMEM scratch; residual + LayerNorm on the final ff step."""
    kk = pl.program_id(1)

    @pl.when(kk == 0)
    def _():
        acc_ref[...] = jnp.zeros_like(acc_ref)

    x = x_ref[...]                                                # (Rt, D) f32
    h = jnp.dot(x.astype(jnp.bfloat16), w1_ref[...],
                preferred_element_type=jnp.float32) + b1_ref[...]
    h = jnp.maximum(h, 0.0)
    acc_ref[...] += jnp.dot(h.astype(jnp.bfloat16), w2_ref[...],
                            preferred_element_type=jnp.float32)

    @pl.when(kk == pl.num_programs(1) - 1)
    def _():
        y = x + acc_ref[...] + b2_ref[...]
        o_ref[...] = _layer_norm(y, g_ref[...], b_ref[...]).astype(o_ref.dtype)


# ----------------------------------------------------------------------------
# pallas_call wrappers
# ----------------------------------------------------------------------------
def mha_block(x_q, x_kv, attn_p, gamma, beta, nhead):
    """x_q: (B, T, D)  x_kv: (B, S, D)  ->  (B, T, D)  (attention + residual + LN)."""
    B, T, D = x_q.shape
    S = x_kv.shape[1]
    t_tile = 128 if T >= 128 else T                  # query-row tile
    grid = (B, pl.cdiv(T, t_tile))

    kernel = functools.partial(fused_mha_block_kernel, nhead=nhead)
    # Grid-invariant weight blocks.
    # TODO(synk): request single-buffering (pipeline_mode=pl.Buffered(1)) for
    #             these constant-index weight specs at production D to halve
    #             their VMEM residency on v7x.
    rep = lambda shape: pl.BlockSpec(shape, lambda b, t: (0, 0))

    flops = 2 * B * (T * D * D            # Q proj
                     + S * D * 2 * D      # KV proj
                     + 2 * T * S * D      # QK^T + PV
                     + T * D * D)         # out proj
    bytes_accessed = 4 * (2 * B * T * D + B * S * D) + 2 * (4 * D * D) + 4 * (8 * D)
    cost = pl.CostEstimate(flops=flops, transcendentals=B * T * (S + 2),
                           bytes_accessed=bytes_accessed)

    return pl.pallas_call(
        kernel,
        out_shape=jax.ShapeDtypeStruct((B, T, D), jnp.float32),
        grid=grid,
        in_specs=[
            pl.BlockSpec((1, t_tile, D), lambda b, t: (b, t, 0)),   # x_q (per batch, per T-tile)
            pl.BlockSpec((1, S, D), lambda b, t: (b, 0, 0)),        # x_kv (per batch)
            rep((D, D)),                                            # w_q  (bf16, scale folded)
            rep((1, D)),                                            # b_q  (f32)
            rep((D, 2 * D)),                                        # w_kv (bf16)
            rep((1, 2 * D)),                                        # b_kv
            rep((D, D)),                                            # w_out
            rep((1, D)),                                            # b_out
            rep((1, D)),                                            # gamma
            rep((1, D)),                                            # beta
        ],
        out_specs=pl.BlockSpec((1, t_tile, D), lambda b, t: (b, t, 0)),
        compiler_params=pltpu.CompilerParams(
            dimension_semantics=("parallel", "parallel"),
            vmem_limit_bytes=_VMEM_LIMIT),
        cost_estimate=cost,
    )(x_q, x_kv,
      attn_p["w_q"], attn_p["b_q"],
      attn_p["w_kv"], attn_p["b_kv"],
      attn_p["w_out"], attn_p["b_out"],
      gamma, beta)


def ffn_block(x, p):
    """x: (B, T, D) -> (B, T, D)   (linear1 + ReLU + linear2 + residual + LN)."""
    B, T, D = x.shape
    rows = B * T
    ff = p["w1"].shape[1]

    # Lane-dense 256-row M tiles at production sizes (fills the 256-wide MXU on
    # v6e/v7x); small shapes get an 8-aligned tile.  Rows are padded instead of
    # falling back to one whole-slab block.
    row_tile = 256 if rows >= 256 else _round_up(rows, 8)
    rows_p = _round_up(rows, row_tile)
    # ff (K) dimension tiled with a reduction grid axis so resident FFN weights
    # stay a few MiB on v7x (64 MiB VMEM, 32 MiB default scoped limit).
    ff_tile = 512 if (ff > 512 and ff % 512 == 0) else ff

    x2 = x.reshape(rows, D)
    if rows_p != rows:
        x2 = jnp.pad(x2, ((0, rows_p - rows), (0, 0)))

    grid = (rows_p // row_tile, ff // ff_tile)

    flops = 4 * rows * D * ff
    bytes_accessed = 4 * 2 * rows * D + 2 * 2 * D * ff + 4 * (ff + 3 * D)
    cost = pl.CostEstimate(flops=flops, transcendentals=rows,
                           bytes_accessed=bytes_accessed)

    y = pl.pallas_call(
        fused_ffn_block_kernel,
        out_shape=jax.ShapeDtypeStruct((rows_p, D), jnp.float32),
        grid=grid,
        in_specs=[
            pl.BlockSpec((row_tile, D), lambda i, k: (i, 0)),       # activations (f32)
            pl.BlockSpec((D, ff_tile), lambda i, k: (0, k)),        # w1 (bf16)
            pl.BlockSpec((1, ff_tile), lambda i, k: (0, k)),        # b1 (f32)
            pl.BlockSpec((ff_tile, D), lambda i, k: (k, 0)),        # w2 (bf16)
            pl.BlockSpec((1, D), lambda i, k: (0, 0)),              # b2
            pl.BlockSpec((1, D), lambda i, k: (0, 0)),              # gamma
            pl.BlockSpec((1, D), lambda i, k: (0, 0)),              # beta
        ],
        out_specs=pl.BlockSpec((row_tile, D), lambda i, k: (i, 0)),
        scratch_shapes=[pltpu.VMEM((row_tile, D), jnp.float32)],
        compiler_params=pltpu.CompilerParams(
            dimension_semantics=("parallel", "arbitrary"),
            vmem_limit_bytes=_VMEM_LIMIT),
        cost_estimate=cost,
    )(x2, p["w1"], p["b1"], p["w2"], p["b2"], p["norm3_weight"], p["norm3_bias"])
    return y[:rows].reshape(B, T, D)


def transformer_decoder_layer(tgt, memory, prepared, nhead):
    """tgt: (T, B, D)   memory: (S, B, D)   ->  (T, B, D)."""
    # Convert once to batch-first for clean per-batch attention blocks; one
    # transpose in, one out.
    x = jnp.transpose(tgt, (1, 0, 2))        # (B, T, D)
    mem = jnp.transpose(memory, (1, 0, 2))   # (B, S, D)

    x = mha_block(x, x, prepared["self_attn"],
                  prepared["norm1_weight"], prepared["norm1_bias"], nhead)
    x = mha_block(x, mem, prepared["multihead_attn"],
                  prepared["norm2_weight"], prepared["norm2_bias"], nhead)
    x = ffn_block(x, prepared)

    return jnp.transpose(x, (1, 0, 2))       # back to (T, B, D)


# ----------------------------------------------------------------------------
# Parameter preparation (runs ONCE, outside the hot path):
# pre-transpose to (in, out), fold softmax scale into W_q / b_q, cast matmul
# weights to bf16, keep biases / LN affine params in f32.
# ----------------------------------------------------------------------------
def prepare_params(params, d_model, nhead):
    hd = d_model // nhead
    scale = hd ** -0.5

    def prep_attn(p):
        w_in, b_in = p["in_proj_weight"], p["in_proj_bias"]       # (3D, D), (3D,)
        return {
            "w_q": (w_in[:d_model] * scale).T.astype(jnp.bfloat16),          # (D, D)
            "b_q": (b_in[:d_model] * scale).reshape(1, d_model).astype(jnp.float32),
            "w_kv": w_in[d_model:].T.astype(jnp.bfloat16),                    # (D, 2D)
            "b_kv": b_in[d_model:].reshape(1, 2 * d_model).astype(jnp.float32),
            "w_out": p["out_proj_weight"].T.astype(jnp.bfloat16),             # (D, D)
            "b_out": p["out_proj_bias"].reshape(1, d_model).astype(jnp.float32),
        }

    ff = params["linear1_weight"].shape[0]
    f32row = lambda a, n: a.reshape(1, n).astype(jnp.float32)
    return {
        "self_attn": prep_attn(params["self_attn"]),
        "multihead_attn": prep_attn(params["multihead_attn"]),
        "w1": params["linear1_weight"].T.astype(jnp.bfloat16),    # (D, ff)
        "b1": f32row(params["linear1_bias"], ff),
        "w2": params["linear2_weight"].T.astype(jnp.bfloat16),    # (ff, D)
        "b2": f32row(params["linear2_bias"], d_model),
        "norm1_weight": f32row(params["norm1_weight"], d_model),
        "norm1_bias": f32row(params["norm1_bias"], d_model),
        "norm2_weight": f32row(params["norm2_weight"], d_model),
        "norm2_bias": f32row(params["norm2_bias"], d_model),
        "norm3_weight": f32row(params["norm3_weight"], d_model),
        "norm3_bias": f32row(params["norm3_bias"], d_model),
    }


# ----------------------------------------------------------------------------
# Pure-JAX f32 reference (PyTorch-convention params) for the numerical check
# ----------------------------------------------------------------------------
def _ref_mha(x_q, x_kv, p, nhead):
    T, B, D = x_q.shape
    S = x_kv.shape[0]
    hd = D // nhead
    w_in, b_in = p["in_proj_weight"], p["in_proj_bias"]
    q = x_q.reshape(T * B, D) @ w_in[:D].T + b_in[:D]
    k = x_kv.reshape(S * B, D) @ w_in[D:2 * D].T + b_in[D:2 * D]
    v = x_kv.reshape(S * B, D) @ w_in[2 * D:].T + b_in[2 * D:]
    q = q * (hd ** -0.5)
    qh = q.reshape(T, B, nhead, hd).transpose(1, 2, 0, 3)
    kh = k.reshape(S, B, nhead, hd).transpose(1, 2, 0, 3)
    vh = v.reshape(S, B, nhead, hd).transpose(1, 2, 0, 3)
    s = jnp.einsum("bhtd,bhsd->bhts", qh, kh)
    p_attn = jax.nn.softmax(s, axis=-1)
    o = jnp.einsum("bhts,bhsd->bhtd", p_attn, vh)
    o = o.transpose(2, 0, 1, 3).reshape(T * B, D)
    o = o @ p["out_proj_weight"].T + p["out_proj_bias"]
    return o.reshape(T, B, D)


def _ref_ln(y, g, b):
    mu = jnp.mean(y, axis=-1, keepdims=True)
    var = jnp.mean((y - mu) ** 2, axis=-1, keepdims=True)
    return (y - mu) * jax.lax.rsqrt(var + _LN_EPS) * g + b


def _ref_layer(tgt, memory, params, nhead):
    t = _ref_ln(tgt + _ref_mha(tgt, tgt, params["self_attn"], nhead),
                params["norm1_weight"], params["norm1_bias"])
    t = _ref_ln(t + _ref_mha(t, memory, params["multihead_attn"], nhead),
                params["norm2_weight"], params["norm2_bias"])
    h = jnp.maximum(t @ params["linear1_weight"].T + params["linear1_bias"], 0.0)
    f = h @ params["linear2_weight"].T + params["linear2_bias"]
    return _ref_ln(t + f, params["norm3_weight"], params["norm3_bias"])


# ----------------------------------------------------------------------------
# Deterministic parameter construction (PyTorch (out, in) convention)
# ----------------------------------------------------------------------------
def make_params(key, d_model, nhead, dim_feedforward):
    ks = jax.random.split(key, 12)
    s = 0.1

    def rnd(k, shape):
        return (s * jax.random.normal(k, shape)).astype(jnp.float32)

    def mha_params(k1, k2):
        return {
            "in_proj_weight": rnd(k1, (3 * d_model, d_model)),
            "in_proj_bias": jnp.zeros((3 * d_model,), jnp.float32),
            "out_proj_weight": rnd(k2, (d_model, d_model)),
            "out_proj_bias": jnp.zeros((d_model,), jnp.float32),
        }

    return {
        "self_attn": mha_params(ks[0], ks[1]),
        "multihead_attn": mha_params(ks[2], ks[3]),
        "linear1_weight": rnd(ks[4], (dim_feedforward, d_model)),
        "linear1_bias": rnd(ks[5], (dim_feedforward,)),
        "linear2_weight": rnd(ks[6], (d_model, dim_feedforward)),
        "linear2_bias": rnd(ks[7], (d_model,)),
        "norm1_weight": jnp.ones((d_model,), jnp.float32),
        "norm1_bias": jnp.zeros((d_model,), jnp.float32),
        "norm2_weight": jnp.ones((d_model,), jnp.float32),
        "norm2_bias": jnp.zeros((d_model,), jnp.float32),
        "norm3_weight": jnp.ones((d_model,), jnp.float32),
        "norm3_bias": jnp.zeros((d_model,), jnp.float32),
    }


if __name__ == "__main__":
    d_model, nhead, dim_feedforward = 32, 4, 64
    T, S, B = 8, 10, 2  # tgt length, memory length, batch
    # NOTE: production benchmarking should use D / hd that are multiples of 128
    # (these toy shapes are for correctness only).

    key = jax.random.PRNGKey(0)
    k_tgt, k_mem, k_par = jax.random.split(key, 3)
    tgt = jax.random.normal(k_tgt, (T, B, d_model), jnp.float32)
    memory = jax.random.normal(k_mem, (S, B, d_model), jnp.float32)

    raw_params = make_params(k_par, d_model, nhead, dim_feedforward)
    prepared = prepare_params(raw_params, d_model, nhead)

    out = transformer_decoder_layer(tgt, memory, prepared, nhead)
    out = jax.block_until_ready(out)

    ref = _ref_layer(tgt, memory, raw_params, nhead)
    assert out.shape == (T, B, d_model)
    # Tolerance reflects bf16 matmul operands (f32 accumulation) and the
    # approximate EUP reciprocal in the softmax normalization.
    np.testing.assert_allclose(np.asarray(out), np.asarray(ref),
                               rtol=5e-2, atol=5e-2)

    print("KERNEL_OK")
</pallas_src>

<mosaic_0001>
module attributes {stable_mosaic.version = 11 : i64} {
  func.func @fused_mha_block_kernel(%arg0: i32, %arg1: i32, %arg2: memref<1x8x32xf32, #tpu.memory_space<vmem>>, %arg3: memref<1x8x32xf32, #tpu.memory_space<vmem>>, %arg4: memref<32x32xbf16, #tpu.memory_space<vmem>>, %arg5: memref<1x32xf32, #tpu.memory_space<vmem>>, %arg6: memref<32x64xbf16, #tpu.memory_space<vmem>>, %arg7: memref<1x64xf32, #tpu.memory_space<vmem>>, %arg8: memref<32x32xbf16, #tpu.memory_space<vmem>>, %arg9: memref<1x32xf32, #tpu.memory_space<vmem>>, %arg10: memref<1x32xf32, #tpu.memory_space<vmem>>, %arg11: memref<1x32xf32, #tpu.memory_space<vmem>>, %arg12: memref<1x8x32xf32, #tpu.memory_space<vmem>>) attributes {dimension_semantics = [#tpu.dimension_semantics<parallel>, #tpu.dimension_semantics<parallel>], iteration_bounds = array<i64: 2, 1>, scalar_prefetch = 0 : i64, scratch_operands = 0 : i64, tpu.core_type = #tpu.core_type<tc>, window_params = [{transform_indices = @transform_0, window_bounds = array<i64: 1, 8, 32>}, {transform_indices = @transform_1, window_bounds = array<i64: 1, 8, 32>}, {pipeline_mode = #tpu.pipeline_mode<synchronous>, transform_indices = @transform_2, window_bounds = array<i64: 32, 32>}, {pipeline_mode = #tpu.pipeline_mode<synchronous>, transform_indices = @transform_3, window_bounds = array<i64: 1, 32>}, {pipeline_mode = #tpu.pipeline_mode<synchronous>, transform_indices = @transform_4, window_bounds = array<i64: 32, 64>}, {pipeline_mode = #tpu.pipeline_mode<synchronous>, transform_indices = @transform_5, window_bounds = array<i64: 1, 64>}, {pipeline_mode = #tpu.pipeline_mode<synchronous>, transform_indices = @transform_6, window_bounds = array<i64: 32, 32>}, {pipeline_mode = #tpu.pipeline_mode<synchronous>, transform_indices = @transform_7, window_bounds = array<i64: 1, 32>}, {pipeline_mode = #tpu.pipeline_mode<synchronous>, transform_indices = @transform_8, window_bounds = array<i64: 1, 32>}, {pipeline_mode = #tpu.pipeline_mode<synchronous>, transform_indices = @transform_9, window_bounds = array<i64: 1, 32>}, {transform_indices = @transform_10, window_bounds = array<i64: 1, 8, 32>}]} {
    %c0 = arith.constant 0 : index
    %c0_0 = arith.constant 0 : index
    %c0_1 = arith.constant 0 : index
    %0 = vector.load %arg2[%c0, %c0_0, %c0_1] : memref<1x8x32xf32, #tpu.memory_space<vmem>>, vector<1x8x32xf32>
    %1 = vector.shape_cast %0 : vector<1x8x32xf32> to vector<8x32xf32>
    %c0_2 = arith.constant 0 : index
    %c0_3 = arith.constant 0 : index
    %c0_4 = arith.constant 0 : index
    %2 = vector.load %arg3[%c0_2, %c0_3, %c0_4] : memref<1x8x32xf32, #tpu.memory_space<vmem>>, vector<1x8x32xf32>
    %3 = vector.shape_cast %2 : vector<1x8x32xf32> to vector<8x32xf32>
    %4 = arith.truncf %1 : vector<8x32xf32> to vector<8x32xbf16>
    %5 = arith.truncf %3 : vector<8x32xf32> to vector<8x32xbf16>
    %c0_5 = arith.constant 0 : index
    %c0_6 = arith.constant 0 : index
    %6 = vector.load %arg4[%c0_5, %c0_6] : memref<32x32xbf16, #tpu.memory_space<vmem>>, vector<32x32xbf16>
    %cst = arith.constant dense<0.000000e+00> : vector<8x32xf32>
    %7 = tpu.matmul %4, %6, %cst {dimension_numbers = #tpu.dot_dimension_numbers<[1], [0], [0], [1], [0, 0, 1, 1], [], []>} : vector<8x32xbf16>, vector<32x32xbf16>, vector<8x32xf32> -> vector<8x32xf32>
    %c0_7 = arith.constant 0 : index
    %c0_8 = arith.constant 0 : index
    %8 = vector.load %arg5[%c0_7, %c0_8] : memref<1x32xf32, #tpu.memory_space<vmem>>, vector<1x32xf32>
    %9 = vector.broadcast %8 : vector<1x32xf32> to vector<8x32xf32>
    %10 = arith.addf %7, %9 : vector<8x32xf32>
    %c0_9 = arith.constant 0 : index
    %c0_10 = arith.constant 0 : index
    %11 = vector.load %arg6[%c0_9, %c0_10] : memref<32x64xbf16, #tpu.memory_space<vmem>>, vector<32x64xbf16>
    %cst_11 = arith.constant dense<0.000000e+00> : vector<8x64xf32>
    %12 = tpu.matmul %5, %11, %cst_11 {dimension_numbers = #tpu.dot_dimension_numbers<[1], [0], [0], [1], [0, 0, 1, 1], [], []>} : vector<8x32xbf16>, vector<32x64xbf16>, vector<8x64xf32> -> vector<8x64xf32>
    %c0_12 = arith.constant 0 : index
    %c0_13 = arith.constant 0 : index
    %13 = vector.load %arg7[%c0_12, %c0_13] : memref<1x64xf32, #tpu.memory_space<vmem>>, vector<1x64xf32>
    %14 = vector.broadcast %13 : vector<1x64xf32> to vector<8x64xf32>
    %15 = arith.addf %12, %14 : vector<8x64xf32>
    %16 = arith.truncf %10 : vector<8x32xf32> to vector<8x32xbf16>
    %17 = vector.extract_strided_slice %15 {offsets = [0, 0], sizes = [8, 32], strides = [1, 1]} : vector<8x64xf32> to vector<8x32xf32>
    %18 = arith.truncf %17 : vector<8x32xf32> to vector<8x32xbf16>
    %19 = vector.extract_strided_slice %15 {offsets = [0, 32], sizes = [8, 32], strides = [1, 1]} : vector<8x64xf32> to vector<8x32xf32>
    %20 = arith.truncf %19 : vector<8x32xf32> to vector<8x32xbf16>
    %21 = vector.extract_strided_slice %16 {offsets = [0, 0], sizes = [8, 8], strides = [1, 1]} : vector<8x32xbf16> to vector<8x8xbf16>
    %22 = vector.extract_strided_slice %18 {offsets = [0, 0], sizes = [8, 8], strides = [1, 1]} : vector<8x32xbf16> to vector<8x8xbf16>
    "tpu.trace_start"() <{level = 10 : i32, message = "td,sd->ts"}> : () -> ()
    %cst_14 = arith.constant dense<0.000000e+00> : vector<8x8xf32>
    %23 = tpu.matmul %21, %22, %cst_14 {dimension_numbers = #tpu.dot_dimension_numbers<[1], [1], [0], [0], [0, 0, 1, 0], [], []>} : vector<8x8xbf16>, vector<8x8xbf16>, vector<8x8xf32> -> vector<8x8xf32>
    "tpu.trace_stop"() : () -> ()
    %cst_15 = arith.constant dense<0xFF800000> : vector<8xf32>
    %24 = vector.multi_reduction <maximumf>, %23, %cst_15 [1] : vector<8x8xf32> to vector<8xf32>
    %25 = vector.shape_cast %24 : vector<8xf32> to vector<8x1xf32>
    %26 = vector.broadcast %25 : vector<8x1xf32> to vector<8x8xf32>
    %27 = arith.subf %23, %26 : vector<8x8xf32>
    %28 = math.exp %27 : vector<8x8xf32>
    %cst_16 = arith.constant dense<0.000000e+00> : vector<8xf32>
    %29 = vector.multi_reduction <add>, %28, %cst_16 [1] : vector<8x8xf32> to vector<8xf32>
    %30 = vector.shape_cast %29 : vector<8xf32> to vector<8x1xf32>
    %31 = arith.truncf %28 : vector<8x8xf32> to vector<8x8xbf16>
    %32 = vector.extract_strided_slice %20 {offsets = [0, 0], sizes = [8, 8], strides = [1, 1]} : vector<8x32xbf16> to vector<8x8xbf16>
    %cst_17 = arith.constant dense<0.000000e+00> : vector<8x8xf32>
    %33 = tpu.matmul %31, %32, %cst_17 {dimension_numbers = #tpu.dot_dimension_numbers<[1], [0], [0], [1], [0, 0, 1, 1], [], []>} : vector<8x8xbf16>, vector<8x8xbf16>, vector<8x8xf32> -> vector<8x8xf32>
    %34 = tpu.reciprocal %30 {approx = true} : vector<8x1xf32> -> vector<8x1xf32>
    %35 = vector.broadcast %34 : vector<8x1xf32> to vector<8x8xf32>
    %36 = arith.mulf %33, %35 : vector<8x8xf32>
    %37 = vector.extract_strided_slice %16 {offsets = [0, 8], sizes = [8, 8], strides = [1, 1]} : vector<8x32xbf16> to vector<8x8xbf16>
    %38 = vector.extract_strided_slice %18 {offsets = [0, 8], sizes = [8, 8], strides = [1, 1]} : vector<8x32xbf16> to vector<8x8xbf16>
    "tpu.trace_start"() <{level = 10 : i32, message = "td,sd->ts"}> : () -> ()
    %cst_18 = arith.constant dense<0.000000e+00> : vector<8x8xf32>
    %39 = tpu.matmul %37, %38, %cst_18 {dimension_numbers = #tpu.dot_dimension_numbers<[1], [1], [0], [0], [0, 0, 1, 0], [], []>} : vector<8x8xbf16>, vector<8x8xbf16>, vector<8x8xf32> -> vector<8x8xf32>
    "tpu.trace_stop"() : () -> ()
    %cst_19 = arith.constant dense<0xFF800000> : vector<8xf32>
    %40 = vector.multi_reduction <maximumf>, %39, %cst_19 [1] : vector<8x8xf32> to vector<8xf32>
    %41 = vector.shape_cast %40 : vector<8xf32> to vector<8x1xf32>
    %42 = vector.broadcast %41 : vector<8x1xf32> to vector<8x8xf32>
    %43 = arith.subf %39, %42 : vector<8x8xf32>
    %44 = math.exp %43 : vector<8x8xf32>
    %cst_20 = arith.constant dense<0.000000e+00> : vector<8xf32>
    %45 = vector.multi_reduction <add>, %44, %cst_20 [1] : vector<8x8xf32> to vector<8xf32>
    %46 = vector.shape_cast %45 : vector<8xf32> to vector<8x1xf32>
    %47 = arith.truncf %44 : vector<8x8xf32> to vector<8x8xbf16>
    %48 = vector.extract_strided_slice %20 {offsets = [0, 8], sizes = [8, 8], strides = [1, 1]} : vector<8x32xbf16> to vector<8x8xbf16>
    %cst_21 = arith.constant dense<0.000000e+00> : vector<8x8xf32>
    %49 = tpu.matmul %47, %48, %cst_21 {dimension_numbers = #tpu.dot_dimension_numbers<[1], [0], [0], [1], [0, 0, 1, 1], [], []>} : vector<8x8xbf16>, vector<8x8xbf16>, vector<8x8xf32> -> vector<8x8xf32>
    %50 = tpu.reciprocal %46 {approx = true} : vector<8x1xf32> -> vector<8x1xf32>
    %51 = vector.broadcast %50 : vector<8x1xf32> to vector<8x8xf32>
    %52 = arith.mulf %49, %51 : vector<8x8xf32>
    %53 = vector.extract_strided_slice %16 {offsets = [0, 16], sizes = [8, 8], strides = [1, 1]} : vector<8x32xbf16> to vector<8x8xbf16>
    %54 = vector.extract_strided_slice %18 {offsets = [0, 16], sizes = [8, 8], strides = [1, 1]} : vector<8x32xbf16> to vector<8x8xbf16>
    "tpu.trace_start"() <{level = 10 : i32, message = "td,sd->ts"}> : () -> ()
    %cst_22 = arith.constant dense<0.000000e+00> : vector<8x8xf32>
    %55 = tpu.matmul %53, %54, %cst_22 {dimension_numbers = #tpu.dot_dimension_numbers<[1], [1], [0], [0], [0, 0, 1, 0], [], []>} : vector<8x8xbf16>, vector<8x8xbf16>, vector<8x8xf32> -> vector<8x8xf32>
    "tpu.trace_stop"() : () -> ()
    %cst_23 = arith.constant dense<0xFF800000> : vector<8xf32>
    %56 = vector.multi_reduction <maximumf>, %55, %cst_23 [1] : vector<8x8xf32> to vector<8xf32>
    %57 = vector.shape_cast %56 : vector<8xf32> to vector<8x1xf32>
    %58 = vector.broadcast %57 : vector<8x1xf32> to vector<8x8xf32>
    %59 = arith.subf %55, %58 : vector<8x8xf32>
    %60 = math.exp %59 : vector<8x8xf32>
    %cst_24 = arith.constant dense<0.000000e+00> : vector<8xf32>
    %61 = vector.multi_reduction <add>, %60, %cst_24 [1] : vector<8x8xf32> to vector<8xf32>
    %62 = vector.shape_cast %61 : vector<8xf32> to vector<8x1xf32>
    %63 = arith.truncf %60 : vector<8x8xf32> to vector<8x8xbf16>
    %64 = vector.extract_strided_slice %20 {offsets = [0, 16], sizes = [8, 8], strides = [1, 1]} : vector<8x32xbf16> to vector<8x8xbf16>
    %cst_25 = arith.constant dense<0.000000e+00> : vector<8x8xf32>
    %65 = tpu.matmul %63, %64, %cst_25 {dimension_numbers = #tpu.dot_dimension_numbers<[1], [0], [0], [1], [0, 0, 1, 1], [], []>} : vector<8x8xbf16>, vector<8x8xbf16>, vector<8x8xf32> -> vector<8x8xf32>
    %66 = tpu.reciprocal %62 {approx = true} : vector<8x1xf32> -> vector<8x1xf32>
    %67 = vector.broadcast %66 : vector<8x1xf32> to vector<8x8xf32>
    %68 = arith.mulf %65, %67 : vector<8x8xf32>
    %69 = vector.extract_strided_slice %16 {offsets = [0, 24], sizes = [8, 8], strides = [1, 1]} : vector<8x32xbf16> to vector<8x8xbf16>
    %70 = vector.extract_strided_slice %18 {offsets = [0, 24], sizes = [8, 8], strides = [1, 1]} : vector<8x32xbf16> to vector<8x8xbf16>
    "tpu.trace_start"() <{level = 10 : i32, message = "td,sd->ts"}> : () -> ()
    %cst_26 = arith.constant dense<0.000000e+00> : vector<8x8xf32>
    %71 = tpu.matmul %69, %70, %cst_26 {dimension_numbers = #tpu.dot_dimension_numbers<[1], [1], [0], [0], [0, 0, 1, 0], [], []>} : vector<8x8xbf16>, vector<8x8xbf16>, vector<8x8xf32> -> vector<8x8xf32>
    "tpu.trace_stop"() : () -> ()
    %cst_27 = arith.constant dense<0xFF800000> : vector<8xf32>
    %72 = vector.multi_reduction <maximumf>, %71, %cst_27 [1] : vector<8x8xf32> to vector<8xf32>
    %73 = vector.shape_cast %72 : vector<8xf32> to vector<8x1xf32>
    %74 = vector.broadcast %73 : vector<8x1xf32> to vector<8x8xf32>
    %75 = arith.subf %71, %74 : vector<8x8xf32>
    %76 = math.exp %75 : vector<8x8xf32>
    %cst_28 = arith.constant dense<0.000000e+00> : vector<8xf32>
    %77 = vector.multi_reduction <add>, %76, %cst_28 [1] : vector<8x8xf32> to vector<8xf32>
    %78 = vector.shape_cast %77 : vector<8xf32> to vector<8x1xf32>
    %79 = arith.truncf %76 : vector<8x8xf32> to vector<8x8xbf16>
    %80 = vector.extract_strided_slice %20 {offsets = [0, 24], sizes = [8, 8], strides = [1, 1]} : vector<8x32xbf16> to vector<8x8xbf16>
    %cst_29 = arith.constant dense<0.000000e+00> : vector<8x8xf32>
    %81 = tpu.matmul %79, %80, %cst_29 {dimension_numbers = #tpu.dot_dimension_numbers<[1], [0], [0], [1], [0, 0, 1, 1], [], []>} : vector<8x8xbf16>, vector<8x8xbf16>, vector<8x8xf32> -> vector<8x8xf32>
    %82 = tpu.reciprocal %78 {approx = true} : vector<8x1xf32> -> vector<8x1xf32>
    %83 = vector.broadcast %82 : vector<8x1xf32> to vector<8x8xf32>
    %84 = arith.mulf %81, %83 : vector<8x8xf32>
    %85 = tpu.concatenate %36, %52, %68, %84 in 1 : vector<8x8xf32>, vector<8x8xf32>, vector<8x8xf32>, vector<8x8xf32> -> vector<8x32xf32>
    %86 = arith.truncf %85 : vector<8x32xf32> to vector<8x32xbf16>
    %c0_30 = arith.constant 0 : index
    %c0_31 = arith.constant 0 : index
    %87 = vector.load %arg8[%c0_30, %c0_31] : memref<32x32xbf16, #tpu.memory_space<vmem>>, vector<32x32xbf16>
    %cst_32 = arith.constant dense<0.000000e+00> : vector<8x32xf32>
    %88 = tpu.matmul %86, %87, %cst_32 {dimension_numbers = #tpu.dot_dimension_numbers<[1], [0], [0], [1], [0, 0, 1, 1], [], []>} : vector<8x32xbf16>, vector<32x32xbf16>, vector<8x32xf32> -> vector<8x32xf32>
    %c0_33 = arith.constant 0 : index
    %c0_34 = arith.constant 0 : index
    %89 = vector.load %arg9[%c0_33, %c0_34] : memref<1x32xf32, #tpu.memory_space<vmem>>, vector<1x32xf32>
    %90 = vector.broadcast %89 : vector<1x32xf32> to vector<8x32xf32>
    %91 = arith.addf %88, %90 : vector<8x32xf32>
    %92 = arith.addf %1, %91 : vector<8x32xf32>
    %c0_35 = arith.constant 0 : index
    %c0_36 = arith.constant 0 : index
    %93 = vector.load %arg10[%c0_35, %c0_36] : memref<1x32xf32, #tpu.memory_space<vmem>>, vector<1x32xf32>
    %c0_37 = arith.constant 0 : index
    %c0_38 = arith.constant 0 : index
    %94 = vector.load %arg11[%c0_37, %c0_38] : memref<1x32xf32, #tpu.memory_space<vmem>>, vector<1x32xf32>
    %cst_39 = arith.constant dense<0.000000e+00> : vector<8xf32>
    %95 = vector.multi_reduction <add>, %92, %cst_39 [1] : vector<8x32xf32> to vector<8xf32>
    %96 = vector.shape_cast %95 : vector<8xf32> to vector<8x1xf32>
    %cst_40 = arith.constant 3.200000e+01 : f32
    %97 = vector.broadcast %cst_40 : f32 to vector<8x1xf32>
    %98 = arith.divf %96, %97 : vector<8x1xf32>
    %99 = vector.broadcast %98 : vector<8x1xf32> to vector<8x32xf32>
    %100 = arith.subf %92, %99 : vector<8x32xf32>
    %101 = arith.mulf %100, %100 : vector<8x32xf32>
    %cst_41 = arith.constant dense<0.000000e+00> : vector<8xf32>
    %102 = vector.multi_reduction <add>, %101, %cst_41 [1] : vector<8x32xf32> to vector<8xf32>
    %103 = vector.shape_cast %102 : vector<8xf32> to vector<8x1xf32>
    %cst_42 = arith.constant 3.200000e+01 : f32
    %104 = vector.broadcast %cst_42 : f32 to vector<8x1xf32>
    %105 = arith.divf %103, %104 : vector<8x1xf32>
    %106 = vector.broadcast %98 : vector<8x1xf32> to vector<8x32xf32>
    %107 = arith.subf %92, %106 : vector<8x32xf32>
    %cst_43 = arith.constant 9.99999974E-6 : f32
    %108 = vector.broadcast %cst_43 : f32 to vector<8x1xf32>
    %109 = arith.addf %105, %108 : vector<8x1xf32>
    %110 = math.rsqrt %109 : vector<8x1xf32>
    %111 = vector.broadcast %110 : vector<8x1xf32> to vector<8x32xf32>
    %112 = arith.mulf %107, %111 : vector<8x32xf32>
    %113 = vector.broadcast %93 : vector<1x32xf32> to vector<8x32xf32>
    %114 = arith.mulf %112, %113 : vector<8x32xf32>
    %115 = vector.broadcast %94 : vector<1x32xf32> to vector<8x32xf32>
    %116 = arith.addf %114, %115 : vector<8x32xf32>
    %c0_44 = arith.constant 0 : index
    %c0_45 = arith.constant 0 : index
    %c0_46 = arith.constant 0 : index
    %117 = vector.load %arg12[%c0_44, %c0_45, %c0_46] : memref<1x8x32xf32, #tpu.memory_space<vmem>>, vector<1x8x32xf32>
    %118 = vector.shape_cast %117 : vector<1x8x32xf32> to vector<8x32xf32>
    %119 = vector.shape_cast %116 : vector<8x32xf32> to vector<1x8x32xf32>
    tpu.vector_store %arg12[%c0_44, %c0_45, %c0_46], %119 {strides = array<i32>} : memref<1x8x32xf32, #tpu.memory_space<vmem>>, vector<1x8x32xf32>,
    return
  }
  func.func @transform_0(%arg0: i32, %arg1: i32) -> (i32, i32, i32) {
    %c0_i32 = arith.constant 0 : i32
    %c0_i32_0 = arith.constant 0 : i32
    return %arg0, %arg1, %c0_i32 : i32, i32, i32
  }
  func.func @transform_1(%arg0: i32, %arg1: i32) -> (i32, i32, i32) {
    %c0_i32 = arith.constant 0 : i32
    %c0_i32_0 = arith.constant 0 : i32
    %c0_i32_1 = arith.constant 0 : i32
    return %arg0, %c0_i32, %c0_i32_0 : i32, i32, i32
  }
  func.func @transform_2(%arg0: i32, %arg1: i32) -> (i32, i32) {
    %c0_i32 = arith.constant 0 : i32
    %c0_i32_0 = arith.constant 0 : i32
    %c0_i32_1 = arith.constant 0 : i32
    return %c0_i32, %c0_i32_0 : i32, i32
  }
  func.func @transform_3(%arg0: i32, %arg1: i32) -> (i32, i32) {
    %c0_i32 = arith.constant 0 : i32
    %c0_i32_0 = arith.constant 0 : i32
    %c0_i32_1 = arith.constant 0 : i32
    return %c0_i32, %c0_i32_0 : i32, i32
  }
  func.func @transform_4(%arg0: i32, %arg1: i32) -> (i32, i32) {
    %c0_i32 = arith.constant 0 : i32
    %c0_i32_0 = arith.constant 0 : i32
    %c0_i32_1 = arith.constant 0 : i32
    return %c0_i32, %c0_i32_0 : i32, i32
  }
  func.func @transform_5(%arg0: i32, %arg1: i32) -> (i32, i32) {
    %c0_i32 = arith.constant 0 : i32
    %c0_i32_0 = arith.constant 0 : i32
    %c0_i32_1 = arith.constant 0 : i32
    return %c0_i32, %c0_i32_0 : i32, i32
  }
  func.func @transform_6(%arg0: i32, %arg1: i32) -> (i32, i32) {
    %c0_i32 = arith.constant 0 : i32
    %c0_i32_0 = arith.constant 0 : i32
    %c0_i32_1 = arith.constant 0 : i32
    return %c0_i32, %c0_i32_0 : i32, i32
  }
  func.func @transform_7(%arg0: i32, %arg1: i32) -> (i32, i32) {
    %c0_i32 = arith.constant 0 : i32
    %c0_i32_0 = arith.constant 0 : i32
    %c0_i32_1 = arith.constant 0 : i32
    return %c0_i32, %c0_i32_0 : i32, i32
  }
  func.func @transform_8(%arg0: i32, %arg1: i32) -> (i32, i32) {
    %c0_i32 = arith.constant 0 : i32
    %c0_i32_0 = arith.constant 0 : i32
    %c0_i32_1 = arith.constant 0 : i32
    return %c0_i32, %c0_i32_0 : i32, i32
  }
  func.func @transform_9(%arg0: i32, %arg1: i32) -> (i32, i32) {
    %c0_i32 = arith.constant 0 : i32
    %c0_i32_0 = arith.constant 0 : i32
    %c0_i32_1 = arith.constant 0 : i32
    return %c0_i32, %c0_i32_0 : i32, i32
  }
  func.func @transform_10(%arg0: i32, %arg1: i32) -> (i32, i32, i32) {
    %c0_i32 = arith.constant 0 : i32
    %c0_i32_0 = arith.constant 0 : i32
    return %arg0, %arg1, %c0_i32 : i32, i32, i32
  }
}

</mosaic_0001>

<bundles_post_ra>
// kernel: tpu_custom_call.1
= control target key start
LH: loop header
LB: loop body
LE: loop exit
PB: predicated region body
PF: predicated region fallthrough
CT: control target
= control target key end

     0   :  { %s2234_s0 = inlined_call_operand.hbm [shape: f32[2,8,32], index: 0, kind: input, shape index: {}]   ;;  %s2235_s1 = inlined_call_operand.hbm [shape: f32[2,8,32], index: 1, kind: input, shape index: {}]   ;;  %s2236_s2 = inlined_call_operand.hbm [shape: bf16[32,32], index: 2, kind: input, shape index: {}]   ;;  %s2237_s3 = inlined_call_operand.vmem [shape: f32[1,32], index: 3, kind: input, shape index: {}]   ;;  %s2238_s4 = inlined_call_operand.hbm [shape: bf16[32,64], index: 4, kind: input, shape index: {}]   ;;  %s2239_s5 = inlined_call_operand.vmem [shape: f32[1,64], index: 5, kind: input, shape index: {}]   ;;  %s2240_s6 = inlined_call_operand.vmem [shape: bf16[32,32], index: 6, kind: input, shape index: {}]   ;;  %s2241_s7 = inlined_call_operand.vmem [shape: f32[1,32], index: 7, kind: input, shape index: {}]   ;;  %s2242_s8 = inlined_call_operand.vmem [shape: f32[1,32], index: 8, kind: input, shape index: {}]   ;;  %s2243_s9 = inlined_call_operand.vmem [shape: f32[1,32], index: 9, kind: input, shape index: {}]   ;;  %s2244_s10 = inlined_call_operand.hbm [shape: f32[2,8,32], index: 10, kind: output, shape index: {}]  }
   0x1   :  { %2254 = sst [smem:[#allocation21_spill]] %s2236_s2 }
   0x2   :  { %2255 = sst [smem:[#allocation22_spill]] %s2238_s4 }
   0x3   :  { %2256 = sst [smem:[#allocation23_spill]] %s2243_s9 }
   0x4   :  { %2257 = sst [smem:[#allocation24_spill]] %s2244_s10 }
   0x5   :  { %15 = vsyncpa [#allocation3], 0 }
   0x6   :  { %17 = vsyncpa [#allocation3 + $0x1], 0 }
   0x7   :  { %18 = vsyncpa [#allocation6], 0 }
   0x8   :  { %20 = vsyncpa [#allocation6 + $0x1], 0 }
   0x9   :  { %21 = vsyncpa [#allocation9], 0 }
   0xa   :  { %22 = vsyncpa [#allocation4], 0 }
   0xb   :  { %24 = vsyncpa [#allocation4 + $0x1], 0  ;;  %s1842_s13 = smov 0   ;;  %s1844_s14 = smov 0  }
   0xc   :  { %s1846_s15 = smov 0   ;;  %s1848_s16 = smov 0  }
   0xd   :  { %s1850_s17 = smov 0   ;;  %s1852_s18 = smov 0  }
   0xe LB: > { %2258 = sst [smem:[#allocation16_spill]] %s1746_s13  ;;  %s1873_s19 = sadd.s32 4294967295, %s1766_s18   ;;  %s1766_s18 = sphi %s1852_s18, %s30_s18   ;;  %s1762_s17 = sphi %s1850_s17, %s2287_s17   ;;  %s1758_s16 = sphi %s1848_s16, %s2286_s16   ;;  %s1754_s15 = sphi %s1846_s15, %s2290_s15   ;;  %s1750_s14 = sphi %s1844_s14, %s2289_s14   ;;  %s1746_s13 = sphi %s1842_s13, %s2288_s13  }
   0xf   : > { %2259 = sst [smem:[#allocation17_spill]] %s1762_s17  ;;  %s1292_s20 = sadd.s32 4294967294, %s1766_s18  }
  0x10   : > { %p64_p0 = scmp.ne.s32.totalorder %s1750_s14, %s1746_s13  ;;  %p2246_p1 = scmp.eq.s32.totalorder %s1873_s19, 0 }
  0x11   : > { %p290_p3 = scmp.eq.s32.totalorder %s1292_s20, 1  ;;  %p1293_p5 = scmp.ge.s32.totalorder %s1766_s18, 1 }
  0x12   : > { %p1882_p4 = por %p2246_p1, %p64_p0  ;;  %p297_p7 = scmp.lt.s32.totalorder %s1766_s18, 3 }
  0x13   : > { %p1887_p6 = por %p290_p3, %p64_p0  ;;  %s1768_s24 = smov [#allocation7]  }
  0x14   : > { %s2260_s21 = scalar_select %p1882_p4, 1, 0 }
  0x15   : > { %s2261_s22 = scalar_select %p1887_p6, 1, 0 }
  0x16   : > { %p1892_p8 = pnand %p1293_p5, %p297_p7  ;;  %s309_s25 = sshll.u32 %s1768_s24, 4  ;;  %s1896_s25 = int_to_ptr.vmem [resolvable:$true] %s309_s25 }
  0x17   : > { %2262 = sst [smem:[#allocation18_spill]] %s2261_s22  ;;  %s1769_s27 = smov [#allocation8]  }
  0x18   : > { %s2263_s23 = scalar_select %p1892_p8, 1, 0 }
  0x19   : > { %p1444_p9 = pneg %p1892_p8  ;;  %s325_s28 = sshll.u32 %s1769_s27, 4  ;;  %s1907_s28 = int_to_ptr.vmem [resolvable:$true] %s325_s28 }
  0x1a   : > { %s2265_s2 = sld [smem:[#allocation21_spill]] }
  0x1b   : > { %p1903_p11 = pnand %p1444_p9, %p2246_p1 }
  0x1d   : > { %p1558_p13 = pneg %p1903_p11 }
  0x20   : > { %s1556_s11 = scalar_lea.hbm %s2265_s2, 256 }
  0x21   : > { %p1557_p12 = scmp.ne.s32.totalorder %s2265_s2, %s1556_s11  ;;  %p1563_p5 = scmp.lt.u32.totalorder %s1556_s11, %s2265_s2 }
  0x23   : > { %p1559_p0 = pnand %p1558_p13, %p1557_p12 }
  0x25   : > { %p1560_p3 = pneg %p1559_p0 }
  0x27   : > { %p1565_p7 = pnand %p1563_p5, %p1560_p3 }
  0x29   : > { %1568 = shalt.err (!%p1565_p7)
}
  0x2a   : > { %s1569_s27 = scalar_lea.vmem %s1896_s25, 256  ;;  %p1577_p2 = scmp.lt.s32.totalorder %s1896_s25, %s1896_s25 }
  0x2b   : > { %p1570_p9 = scmp.ne.s32.totalorder %s1896_s25, %s1569_s27  ;;  %p1578_p12 = scmp.lt.s32.totalorder %s1569_s27, %s1569_s27 }
  0x2d   : > { %p1572_p10 = pnand %p1570_p9, %p1558_p13  ;;  %p1579_p0 = por %p1578_p12, %p1577_p2 }
  0x2f   : > { %p1573_p1 = pneg %p1572_p10 }
  0x31   : > { %p1580_p6 = pnand %p1579_p0, %p1573_p1 }
  0x33   : > { %1583 = shalt.err (!%p1580_p6)
}
  0x34   : > { %s1770_s22 = smov 64   ;;  %s1771_s29 = smov 4  }
  0x35   : > { %1447 = dma.hbm_to_vmem [thread:$0]  (!%p1903_p11), %s2265_s2, 256, %s1896_s25, [#allocation6], %s1770_s22, %s1770_s22, %s1771_s29  }
  0x36   : > { %s2266_s4 = sld [smem:[#allocation22_spill]] }
  0x3c   : > { %s1584_s24 = scalar_lea.hbm %s2266_s4, 256 }
  0x3d   : > { %p1585_p2 = scmp.ne.s32.totalorder %s2266_s4, %s1584_s24  ;;  %p1591_p10 = scmp.lt.u32.totalorder %s1584_s24, %s2266_s4 }
  0x3f   : > { %p1587_p1 = pnand %p1585_p2, %p1558_p13 }
  0x41   : > { %p1588_p6 = pneg %p1587_p1 }
  0x43   : > { %p1593_p3 = pnand %p1591_p10, %p1588_p6 }
  0x45   : > { %1596 = shalt.err (!%p1593_p3)
}
  0x46   : > { %s1597_s25 = scalar_lea.vmem %s1907_s28, 256  ;;  %p1605_p12 = scmp.lt.s32.totalorder %s1907_s28, %s1907_s28 }
  0x47   : > { %p1598_p5 = scmp.ne.s32.totalorder %s1907_s28, %s1597_s25  ;;  %p1606_p0 = scmp.lt.s32.totalorder %s1597_s25, %s1597_s25 }
  0x49   : > { %p1600_p7 = pnand %p1598_p5, %p1558_p13  ;;  %p1607_p2 = por %p1606_p0, %p1605_p12 }
  0x4b   : > { %p1601_p9 = pneg %p1600_p7 }
  0x4d   : > { %p1608_p1 = pnand %p1607_p2, %p1601_p9 }
  0x4f   : > { %1611 = shalt.err (!%p1608_p1)
}
  0x50   : > { %1450 = dma.hbm_to_vmem [thread:$0]  (!%p1903_p11), %s2266_s4, 256, %s1907_s28, [#allocation9], %s1770_s22, %s1770_s22, %s1771_s29  }
  0x51   : > { %s42_s13 = sadd.s32 1, %s1762_s17  ;;  %s51_s30 = sadd.s32 1, %s1754_s15 }
  0x52   : > { %p44_p13 = scmp.ge.s32.totalorder %s42_s13, 2  ;;  %p58_p6 = scmp.ne.s32.totalorder %s1754_s15, %s1750_s14 }
  0x53   : > { %p59_p10 = scmp.eq.s32.totalorder %s1766_s18, 0  ;;  %p1464_p3 = scmp.lt.s32.totalorder %s1766_s18, 2 }
  0x54   : > { %s2292_s13 = smov (%p44_p13, %s42_s13), 0  ;;  %p2268_p7 = scmp.eq.s32.totalorder %s1873_s19, 1 }
  0x55   : > { %2267 = sst [smem:[#allocation19_spill]] %s2292_s13  ;;  %p60_p5 = por %p59_p10, %p58_p6 }
  0x56   : > { %p1971_p9 = por %p2268_p7, %p58_p6  ;;  %s46_s11 = ssub.s32 %s1762_s17, %s2292_s13 }
  0x57   : > { %s354_s12 = sand.u32 1, %s1754_s15   ;;  %p49_p12 = scmp.eq.s32.totalorder %s46_s11, 0 }
  0x58   : > { %s2269_s26 = scalar_select %p1971_p9, 1, 0 }
  0x59   : > { %s1978_s28 = sshll.u32 %s354_s12, 3  ;;  %s1298_s22 = sshll.u32 %s1762_s17, 7 }
  0x5a   : > { %s1982_s29 = scalar_select %p49_p12, %s1754_s15, %s51_s30  }
  0x5b   : > { %s1987_s27 = scalar_lea.hbm %s2234_s0, %s1298_s22  ;;  %s358_s25 = scalar_lea.vmem [#allocation2], %s1978_s28 }
  0x5c   : > { %2270 = sst [smem:[#allocation20_spill]] %s1982_s29  ;;  %s366_s9 = sshll.u32 %s358_s25, 4  ;;  %s1996_s9 = int_to_ptr.vmem [resolvable:$true] %s366_s9 }
  0x5d   : > { %p1992_p11 = pnand %p1464_p3, %p60_p5  ;;  %s2001_s20 = scalar_lea.hbm %s2235_s1, %s1298_s22 }
  0x5e   : > { %s355_s24 = scalar_lea.sflag [#allocation3], %s354_s12  ;;  %s1612_s2 = scalar_lea.hbm %s1987_s27, 128 }
  0x5f   : > { %p1613_p0 = scmp.ne.s32.totalorder %s1987_s27, %s1612_s2  ;;  %p1614_p2 = pneg %p1992_p11 }
  0x60   : > { %s1617_s13 = scalar_lea.hbm %s2234_s0, 256  ;;  %p1618_p6 = scmp.lt.u32.totalorder %s1987_s27, %s2234_s0 }
  0x61   : > { %p1615_p1 = pnand %p1614_p2, %p1613_p0  ;;  %p1619_p10 = scmp.lt.u32.totalorder %s1617_s13, %s1612_s2 }
  0x62   : > { %p1621_p5 = scmp.lt.u32.totalorder %s1612_s2, %s1987_s27 }
  0x63   : > { %p1616_p13 = pneg %p1615_p1  ;;  %p1620_p3 = por %p1619_p10, %p1618_p6 }
  0x65   : > { %p1622_p7 = por %p1621_p5, %p1620_p3 }
  0x67   : > { %p1623_p12 = pnand %p1622_p7, %p1616_p13 }
  0x69   : > { %1626 = shalt.err (!%p1623_p12)
}
  0x6a   : > { %s1627_s12 = scalar_lea.vmem %s1996_s9, 128  ;;  %s1772_s4 = smov [#allocation2]  }
  0x6b   : > { %p1628_p0 = scmp.ne.s32.totalorder %s1996_s9, %s1627_s12  ;;  %s1632_s22 = sshll.u32 %s1772_s4, 4  ;;  %s1633_s22 = int_to_ptr.vmem [resolvable:$false] %s1632_s22 }
  0x6c   : > { %s1634_s17 = scalar_lea.vmem %s1633_s22, 256  ;;  %p1635_p4 = scmp.lt.s32.totalorder %s1996_s9, %s1633_s22 }
  0x6d   : > { %p1630_p1 = pnand %p1628_p0, %p1614_p2  ;;  %p1636_p6 = scmp.lt.s32.totalorder %s1634_s17, %s1627_s12 }
  0x6f   : > { %p1631_p9 = pneg %p1630_p1  ;;  %p1637_p10 = por %p1636_p6, %p1635_p4 }
  0x71   : > { %p1638_p3 = pnand %p1637_p10, %p1631_p9 }
  0x73   : > { %1641 = shalt.err (!%p1638_p3)
}
  0x74   : > { %1454 = dma.hbm_to_vmem [thread:$0]  (!%p1992_p11), %s1987_s27, 128, %s1996_s9, %s355_s24  }
  0x75   : > { %s373_s2 = sand.u32 1, %s1766_s18   ;;  %s377_s13 = scalar_lea.vmem [#allocation5], %s1978_s28 }
  0x76   : > { %s384_s29 = sshll.u32 %s377_s13, 4  ;;  %s374_s30 = scalar_lea.sflag [#allocation6], %s373_s2  ;;  %s385_s29 = int_to_ptr.vmem [resolvable:$true] %s384_s29 }
  0x77   : > { %s1642_s11 = scalar_lea.hbm %s2001_s20, 128  ;;  %s1647_s4 = scalar_lea.hbm %s2235_s1, 256 }
  0x78   : > { %p1643_p4 = scmp.ne.s32.totalorder %s2001_s20, %s1642_s11  ;;  %p1648_p5 = scmp.lt.u32.totalorder %s2001_s20, %s2235_s1 }
  0x79   : > { %p1649_p7 = scmp.lt.u32.totalorder %s1647_s4, %s1642_s11  ;;  %p1651_p0 = scmp.lt.u32.totalorder %s1642_s11, %s2001_s20 }
  0x7a   : > { %p1645_p9 = pnand %p1643_p4, %p1614_p2 }
  0x7b   : > { %p1650_p12 = por %p1649_p7, %p1648_p5 }
  0x7c   : > { %p1646_p13 = pneg %p1645_p9 }
  0x7d   : > { %p1652_p1 = por %p1651_p0, %p1650_p12 }
  0x7f   : > { %p1653_p6 = pnand %p1652_p1, %p1646_p13 }
  0x81   : > { %1656 = shalt.err (!%p1653_p6)
}
  0x82   : > { %s1657_s28 = scalar_lea.vmem %s385_s29, 128  ;;  %s1773_s27 = smov [#allocation5]  }
  0x83   : > { %p1658_p10 = scmp.ne.s32.totalorder %s385_s29, %s1657_s28  ;;  %s1662_s9 = sshll.u32 %s1773_s27, 4  ;;  %s1663_s9 = int_to_ptr.vmem [resolvable:$false] %s1662_s9 }
  0x84   : > { %s1664_s24 = scalar_lea.vmem %s1663_s9, 256  ;;  %p1665_p9 = scmp.lt.s32.totalorder %s385_s29, %s1663_s9 }
  0x85   : > { %p1660_p3 = pnand %p1658_p10, %p1614_p2  ;;  %p1666_p8 = scmp.lt.s32.totalorder %s1664_s24, %s1657_s28 }
  0x87   : > { %p1661_p4 = pneg %p1660_p3  ;;  %p1667_p5 = por %p1666_p8, %p1665_p9 }
  0x89   : > { %p1668_p7 = pnand %p1667_p5, %p1661_p4 }
  0x8b   : > { %1671 = shalt.err (!%p1668_p7)
}
  0x8c   : > { %1457 = dma.hbm_to_vmem [thread:$0]  (!%p1992_p11), %s2001_s20, 128, %s385_s29, %s374_s30  }
  0x8d   : > { %p2272_p13 = scmp.ne.s32.totalorder %s2263_s23, 0 }
  0x8e   : > { %s2052_s2 = sand.u32 (!%p2272_p13), 1, %s1750_s14   ;;  %p2273_p8 = scmp.ne.s32.totalorder (!%p2272_p13), %s2260_s21, 0 }
  0x8f   : > { %393 = sbr.rel (%p2272_p13) target bundleno = 1780 (0x6f4), region = 60  ;;  %s2055_s13 = sshll.u32 (!%p2272_p13), %s2052_s2, 3 }
  0x90   : > { %s396_s11 = scalar_lea.sflag (!%p2272_p13), [#allocation3], %s2052_s2  ;;  %s399_s25 = scalar_lea.vmem (!%p2272_p13), [#allocation2], %s2055_s13 }
  0x96   : > { %1725 = dma.done.wait (%p2273_p8), %s396_s11, 128  }
  0x97   : > { %1727 = vsyncadd (%p2273_p8), %s396_s11, 4294967168  ;;  %s404_s23 = sand.u32 1, %s1873_s19   ;;  %s408_s20 = scalar_lea.vmem [#allocation5], %s2055_s13 }
  0x98   : > { %s405_s10 = scalar_lea.sflag [#allocation6], %s404_s23 }
  0x99   : > { %1729 = dma.done.wait (%p2273_p8), %s405_s10, 128  }
  0x9a   : > { %1731 = vsyncadd (%p2273_p8), %s405_s10, 4294967168  ;;  %p2274_p11 = scmp.eq.s32.totalorder %s1873_s19, 0 }
  0x9c   : > { %1733 = dma.done.wait (%p2274_p11), [#allocation6], 256   ;;  %p2275_p2 = pmov %p2274_p11 }
  0x9e   : > { %1735 = vsyncadd (%p2275_p2), [#allocation6], 4294967040  ;;  %p2276_p12 = pmov %p2275_p2 }
  0x9f   : > { %p2277_p0 = pmov %p2275_p2 }
  0xa0   : > { %1737 = dma.done.wait (%p2276_p12), [#allocation9], 256  }
  0xa1   : > { %1739 = vsyncadd (%p2277_p0), [#allocation9], 4294967040  ;;  %v1774_v0 = vmov 0.0   ;;  %vm1775_vm0 = vmmov 0   ;;  %v1532_v1 = vld [vmem:[#allocation8] sm:$0xff]   ;;  %v1533_v2 = vld [vmem:[#allocation7] sm:$0xff]  }
  0xa2   : > { %1366 = vmatprep.subr.bf16.mxu1 %v1774_v0  ;;  %1358 = vmatprep.subr.bf16.mxu0 %v1774_v0  ;;  %v1534_v3 = vld [vmem:[#allocation8 + $0x8] sm:$0xff]   ;;  %v1535_v5 = vld [vmem:[#allocation7 + $0x8] sm:$0xff]   ;;  %vm486_vm1 = vcmask 261120   ;;  %v1311_v9 = vld [vmem:[%s2239_s5] ss:$0 sm:$0xff]  ;;  %vm598_vm2 = vcmask 64512  }
  0xa3   : > { %1370 = vmatprep.mubr.msk.bf16.mxu1 %vm1775_vm0, %v1774_v0  ;;  %1362 = vmatprep.mubr.msk.bf16.mxu0 %vm1775_vm0, %v1774_v0  ;;  %v460_v4 = vld [vmem:[%s408_s20] sm:$0xff]  ;;  %v2085_v6 = vld [vmem:[%s399_s25] sm:$0xff]  ;;  %s1776_s12 = smov 112   ;;  %s1777_s4 = smov 120   ;;  %vm661_vm3 = vcmask 1043456   ;;  %vm1051_vm4 = vcmask 130048  }
  0xa4   : > { %1367 = vmatpush3.bf16.msra.mxu1 %v1532_v1  ;;  %1359 = vmatpush3.bf16.msra.mxu0 %v1533_v2  ;;  %v462_v7 = vpack.c.bf16 %v460_v4, %v460_v4  ;;  %v461_v8 = vpack.c.bf16 %v2085_v6, %v2085_v6  ;;  %v1307_v10 = vld [vmem:[%s2237_s3] ss:$0 sm:$0xff]  ;;  %s1778_s22 = smov 104   ;;  %s1779_s17 = smov 96   ;;  %vm1053_vm5 = vcmask 195584  }
  0xa5   : > { %1368 = vmatprep.subr.bf16.mxu1 %v1774_v0  ;;  %1360 = vmatprep.subr.bf16.mxu0 %v1774_v0  ;;  %s1780_s28 = smov 80   ;;  %s1781_s27 = smov 72  }
  0xa6   : > { %s1782_s9 = smov 88   ;;  %s1783_s25 = smov 8  }
  0xa7   : > { %s1784_s20 = smov 16   ;;  %s1785_s19 = smov 24  }
  0xa8   : > { %1369 = vmatpush3.bf16.msra.mxu1 %v1534_v3  ;;  %1361 = vmatpush3.bf16.msra.mxu0 %v1535_v5  ;;  %s1155_s10 = scalar_lea.sflag [#allocation4], %s2052_s2  ;;  %p2280_p6 = scmp.ne.s32.totalorder %s2269_s26, 0 }
  0xa9   : > { %1380 = vmatprep.subr.bf16.mxu1 %v1774_v0  ;;  %1374 = vmatprep.subr.bf16.mxu0 %v1774_v0 }
  0xab   : > { %1371 = vmatmul.mubr.msk.bf16.vlgmr.msra.gmra.mrb[0].mxu1 %vm486_vm1, %v462_v7  ;;  %1363 = vmatmul.mubr.msk.bf16.vlgmr.msra.gmra.mrb[0].mxu0 %vm486_vm1, %v461_v8 }
  0xac   : > { %1382 = vmatprep.mubr.msk.bf16.mxu1 %vm1775_vm0, %v1774_v0  ;;  %1376 = vmatprep.mubr.msk.bf16.mxu0 %vm1775_vm0, %v1774_v0 }
 0x17e   : > { %v590_v11 = vpop.f32.mrb[0].mxu1  ;;  %v524_v14 = vpop.f32.mrb[0].mxu0 }
 0x17f   : > { %v591_v12 = vadd.f32 %v1311_v9, %v590_v11  ;;  %v1372_v13 = vpop.f32.mrb[1].mxu1  ;;  %v525_v16 = vadd.f32 %v1307_v10, %v524_v14  ;;  %v1364_v17 = vpop.f32.mrb[1].mxu0 }
 0x180   : > { %v593_v15 = vpop.f32.mrb[2].mxu1  ;;  %v527_v20 = vpop.f32.mrb[2].mxu0 }
 0x181   : > { %v2103_v18 = vpack.c.bf16 %v591_v12, %v591_v12  ;;  %v1373_v19 = vpop.f32.mrb[3].mxu1  ;;  %v1365_v21 = vpop.f32.mrb[3].mxu0  ;;  %v596_v22 = vpack.c.bf16 %v525_v16, %v525_v16 }
 0x183   : > { %820 = vrot.lane.b32.xlu1 %v2103_v18, %s1776_s12  ;;  %710 = vrot.lane.b32.xlu0 %v2103_v18, %s1777_s4  ;;  %v603_v23 = vsel %vm598_vm2, %v2103_v18, 0 }
 0x184   : > { %1375 = vmatpush3.bf16.xpose.msra.mxu0 %v603_v23 }
 0x185   : > { %1386 = vmatprep.subr.bf16.mxu0 %v1774_v0 }
 0x187   : > { %818 = vrot.lane.b32.xlu1 %v596_v22, %s1776_s12  ;;  %708 = vrot.lane.b32.xlu0 %v596_v22, %s1777_s4 }
 0x18b   : > { %928 = vrot.lane.b32.xlu1 %v596_v22, %s1778_s22  ;;  %930 = vrot.lane.b32.xlu0 %v2103_v18, %s1778_s22 }
 0x18c   : > { %1377 = vmatmul.mubr.msk.bf16.vlgmr.msra.gmra.mrb[4].mxu0 %vm598_vm2, %v596_v22 }
 0x18d   : > { %1388 = vmatprep.mubr.msk.bf16.mxu0 %vm1775_vm0, %v1774_v0 }
 0x18f   : > { %656 = vrot.lane.b32.xlu1 %v2103_v18, %s1779_s17  ;;  %s2278_s17 = sld [smem:[#allocation23_spill]] }
 0x1f5   : > { %v821_v24 = vpop.permute.xlu1 %820  ;;  %v711_v25 = vpop.permute.xlu0 %710 }
 0x1f6   : > { %v716_v26 = vsel %vm598_vm2, %v711_v25, 0  ;;  %v826_v30 = vsel %vm598_vm2, %v821_v24, 0 }
 0x1f7   : > { %1387 = vmatpush3.bf16.xpose.msra.mxu0 %v716_v26 }
 0x1f8   : > { %1398 = vmatprep.subr.bf16.mxu0 %v1774_v0 }
 0x1f9   : > { %v819_v27 = vpop.permute.xlu1 %818  ;;  %v709_v28 = vpop.permute.xlu0 %708 }
 0x1fd   : > { %v929_v29 = vpop.permute.xlu1 %928  ;;  %v931_v33 = vpop.permute.xlu0 %930 }
 0x1fe   : > { %1389 = vmatmul.mubr.msk.bf16.vlgmr.msra.gmra.mrb[8].mxu0 %vm598_vm2, %v709_v28  ;;  %v936_v34 = vsel %vm598_vm2, %v931_v33, 0 }
 0x1ff   : > { %1399 = vmatpush3.bf16.xpose.msra.mxu0 %v826_v30  ;;  %1400 = vmatprep.mubr.msk.bf16.mxu0 %vm1775_vm0, %v1774_v0 }
 0x200   : > { %1410 = vmatprep.subr.bf16.mxu0 %v1774_v0 }
 0x201   : > { %v657_v31 = vpop.permute.xlu1 %656 }
 0x202   : > { %v663_v32 = vsel %vm661_vm3, %v657_v31, 0 }
 0x203   : > { %1381 = vmatpush3.bf16.msra.mxu1 %v663_v32 }
 0x204   : > { %1392 = vmatprep.subr.bf16.mxu1 %v1774_v0 }
 0x206   : > { %1401 = vmatmul.mubr.msk.bf16.vlgmr.msra.gmra.mrb[12].mxu0 %vm598_vm2, %v819_v27 }
 0x207   : > { %1411 = vmatpush3.bf16.xpose.msra.mxu0 %v936_v34  ;;  %1412 = vmatprep.mubr.msk.bf16.mxu0 %vm1775_vm0, %v1774_v0 }
 0x208   : > { %1422 = vmatprep.subr.bf16.mxu0 %v1774_v0 }
 0x20e   : > { %1413 = vmatmul.mubr.msk.bf16.vlgmr.msra.gmra.mrb[16].mxu0 %vm598_vm2, %v929_v29  ;;  %v1536_v29 = vld [vmem:[%s2240_s6] sm:$0xff]  }
 0x20f   : > { %1426 = vmatprep.mubr.msk.bf16.mxu0 %vm1775_vm0, %v1774_v0  ;;  %1423 = vmatpush3.bf16.msra.mxu0 %v1536_v29 }
 0x210   : > { %1424 = vmatprep.subr.bf16.mxu0 %v1774_v0 }
 0x25f   : > { %v639_v35 = vpop.f32.mrb[4].mxu0 }
 0x260   : > { %v1378_v36 = vpop.f32.mrb[5].mxu0  ;;  %v645_v37 = vsel %vm598_vm2, %v639_v35, -inf }
 0x261   : > { %646 = vmax.xlane.f32.xlu0 %v645_v37  ;;  %v642_v38 = vpop.f32.mrb[6].mxu0  ;;  %v1537_v37 = vld [vmem:[%s2240_s6 + $0x8] sm:$0xff]  }
 0x262   : > { %v1379_v39 = vpop.f32.mrb[7].mxu0  ;;  %1425 = vmatpush3.bf16.msra.mxu0 %v1537_v37 }
 0x2d1   : > { %v752_v40 = vpop.f32.mrb[8].mxu0 }
 0x2d2   : > { %v1390_v41 = vpop.f32.mrb[9].mxu0  ;;  %v758_v42 = vsel %vm598_vm2, %v752_v40, -inf }
 0x2d3   : > { %759 = vmax.xlane.f32.xlu1 %v758_v42  ;;  %v755_v43 = vpop.f32.mrb[10].mxu0 }
 0x2d4   : > { %v1391_v44 = vpop.f32.mrb[11].mxu0 }
 0x2d9   : > { %v862_v45 = vpop.f32.mrb[12].mxu0 }
 0x2da   : > { %v1402_v46 = vpop.f32.mrb[13].mxu0  ;;  %v868_v47 = vsel %vm598_vm2, %v862_v45, -inf }
 0x2db   : > { %869 = vmax.xlane.f32.xlu0 %v868_v47  ;;  %v865_v48 = vpop.f32.mrb[14].mxu0 }
 0x2dc   : > { %v1403_v49 = vpop.f32.mrb[15].mxu0 }
 0x2e1   : > { %v972_v50 = vpop.f32.mrb[16].mxu0 }
 0x2e2   : > { %v1414_v51 = vpop.f32.mrb[17].mxu0  ;;  %v978_v52 = vsel %vm598_vm2, %v972_v50, -inf }
 0x2e3   : > { %979 = vmax.xlane.f32.xlu0 %v978_v52  ;;  %v975_v53 = vpop.f32.mrb[18].mxu0 }
 0x2e4   : > { %878 = vrot.lane.b32.xlu1 %v2103_v18, %s1780_s28  ;;  %v1415_v54 = vpop.f32.mrb[19].mxu0  ;;  %s1330_s28 = sshll.u32 %s1758_s16, 7  ;;  %s1786_s16 = smov [#allocation10]  }
 0x2e8   : > { %988 = vrot.lane.b32.xlu1 %v2103_v18, %s1781_s27  ;;  %s457_s27 = scalar_lea.vmem [#allocation10], %s2055_s13  ;;  %s1676_s13 = sshll.u32 %s1786_s16, 4  ;;  %s1677_s13 = int_to_ptr.vmem [resolvable:$false] %s1676_s13 }
 0x2ee   : > { %v647_v55 = vpop.xlane.xlu0 %646 }
 0x2ef   : > { %v648_v56 = vsub.f32 %v639_v35, %v647_v55 }
 0x2f1   : > { %v649_v57 = vmul.f32 1.442695, %v648_v56 }
 0x2f3   : > { %1538 = vpow2.f32 %v649_v57 }
 0x2f9   : > { %768 = vrot.lane.b32.xlu0 %v2103_v18, %s1782_s9  ;;  %s1169_s9 = sshll.u32 %s457_s27, 4  ;;  %s2186_s9 = int_to_ptr.vmem [resolvable:$true] %s1169_s9 }
 0x2fa   : > { %p1679_p4 = scmp.lt.s32.totalorder %s2186_s9, %s1677_s13 }
 0x2fd   : > { %v1539_v58 = vpop.eup %1538 }
 0x2fe   : > { %v654_v59 = vpack.c.bf16 %v1539_v58, %v1539_v58  ;;  %v651_v21 = vsel %vm598_vm2, %v1539_v58, 0.0 }
 0x300   : > { %1383 = vmatmul.mubr.msk.bf16.vlgmr.msra.gmra.mrb[4].mxu1 %vm598_vm2, %v654_v59  ;;  %v1323_v59 = vld [vmem:[%s2241_s7] ss:$0 sm:$0xff] }
 0x301   : > { %1394 = vmatprep.mubr.msk.bf16.mxu1 %vm1775_vm0, %v1774_v0 }
 0x360   : > { %v760_v60 = vpop.xlane.xlu1 %759 }
 0x361   : > { %v761_v61 = vsub.f32 %v752_v40, %v760_v60 }
 0x363   : > { %v762_v62 = vmul.f32 1.442695, %v761_v61 }
 0x364   : > { %v879_v11 = vpop.permute.xlu1 %878 }
 0x365   : > { %1540 = vpow2.f32 %v762_v62  ;;  %v884_v15 = vsel %vm661_vm3, %v879_v11, 0 }
 0x368   : > { %v870_v63 = vpop.xlane.xlu0 %869  ;;  %v989_v16 = vpop.permute.xlu1 %988 }
 0x369   : > { %v871_v1 = vsub.f32 %v862_v45, %v870_v63  ;;  %v994_v20 = vsel %vm661_vm3, %v989_v16, 0 }
 0x36b   : > { %v872_v2 = vmul.f32 1.442695, %v871_v1 }
 0x36d   : > { %1542 = vpow2.f32 %v872_v2 }
 0x36f   : > { %v1541_v3 = vpop.eup %1540 }
 0x370   : > { %v980_v4 = vpop.xlane.xlu0 %979  ;;  %v764_v5 = vsel %vm598_vm2, %v1541_v3, 0.0  ;;  %v767_v13 = vpack.c.bf16 %v1541_v3, %v1541_v3 }
 0x371   : > { %v981_v7 = vsub.f32 %v972_v50, %v980_v4  ;;  %765 = vadd.xlane.f32.xlu0 %v764_v5 }
 0x373   : > { %v982_v8 = vmul.f32 1.442695, %v981_v7 }
 0x374   : > { %v769_v9 = vpop.permute.xlu0 %768 }
 0x375   : > { %1544 = vpow2.f32 %v982_v8  ;;  %v774_v10 = vsel %vm661_vm3, %v769_v9, 0 }
 0x376   : > { %1393 = vmatpush3.bf16.msra.mxu1 %v774_v10 }
 0x377   : > { %v1543_v12 = vpop.eup %1542  ;;  %1404 = vmatprep.subr.bf16.mxu1 %v1774_v0 }
 0x378   : > { %v874_v14 = vsel %vm598_vm2, %v1543_v12, 0.0  ;;  %v877_v18 = vpack.c.bf16 %v1543_v12, %v1543_v12 }
 0x379   : > { %875 = vadd.xlane.f32.xlu1 %v874_v14  ;;  %1395 = vmatmul.mubr.msk.bf16.vlgmr.msra.gmra.mrb[8].mxu1 %vm598_vm2, %v767_v13 }
 0x37a   : > { %1405 = vmatpush3.bf16.msra.mxu1 %v884_v15  ;;  %1406 = vmatprep.mubr.msk.bf16.mxu1 %vm1775_vm0, %v1774_v0  ;;  %v1328_v15 = vld [vmem:[%s2278_s17] ss:$0 sm:$0xff] }
 0x37b   : > { %1416 = vmatprep.subr.bf16.mxu1 %v1774_v0 }
 0x37f   : > { %v1545_v17 = vpop.eup %1544 }
 0x380   : > { %v984_v19 = vsel %vm598_vm2, %v1545_v17, 0.0  ;;  %v987_v22 = vpack.c.bf16 %v1545_v17, %v1545_v17 }
 0x381   : > { %985 = vadd.xlane.f32.xlu0 %v984_v19  ;;  %1407 = vmatmul.mubr.msk.bf16.vlgmr.msra.gmra.mrb[12].mxu1 %vm598_vm2, %v877_v18 }
 0x382   : > { %1417 = vmatpush3.bf16.msra.mxu1 %v994_v20  ;;  %1418 = vmatprep.mubr.msk.bf16.mxu1 %vm1775_vm0, %v1774_v0 }
 0x385   : > { %652 = vadd.xlane.f32.xlu0 %v651_v21 }
 0x389   : > { %1419 = vmatmul.mubr.msk.bf16.vlgmr.msra.gmra.mrb[16].mxu1 %vm598_vm2, %v987_v22 }
 0x3d3   : > { %v699_v23 = vpop.f32.mrb[4].mxu1 }
 0x3d4   : > { %v1384_v24 = vpop.f32.mrb[5].mxu1 }
 0x3d5   : > { %v702_v25 = vpop.f32.mrb[6].mxu1 }
 0x3d6   : > { %v1385_v26 = vpop.f32.mrb[7].mxu1 }
 0x3fe   : > { %v766_v27 = vpop.xlane.xlu0 %765 }
 0x3ff   : > { %1546 = vrcp.f32 %v766_v27 }
 0x406   : > { %v876_v28 = vpop.xlane.xlu1 %875 }
 0x407   : > { %1548 = vrcp.f32 %v876_v28 }
 0x409   : > { %v1547_v30 = vpop.eup %1546 }
 0x40e   : > { %v986_v35 = vpop.xlane.xlu0 %985 }
 0x40f   : > { %1550 = vrcp.f32 %v986_v35 }
 0x411   : > { %v1549_v38 = vpop.eup %1548 }
 0x412   : > { %v653_v49 = vpop.xlane.xlu0 %652 }
 0x413   : > { %1552 = vrcp.f32 %v653_v49 }
 0x419   : > { %v1551_v0 = vpop.eup %1550 }
 0x41d   : > { %v1553_v50 = vpop.eup %1552 }
 0x41e   : > { %v706_v52 = vmul.f32 %v1553_v50, %v699_v23 }
 0x44c   : > { %v810_v31 = vpop.f32.mrb[8].mxu1 }
 0x44d   : > { %v817_v32 = vmul.f32 %v1547_v30, %v810_v31  ;;  %v1396_v33 = vpop.f32.mrb[9].mxu1 }
 0x44e   : > { %v813_v34 = vpop.f32.mrb[10].mxu1 }
 0x44f   : > { %v1397_v36 = vpop.f32.mrb[11].mxu1  ;;  %1039 = vrot.lane.b32.xlu1 %v817_v32, %s1783_s25  ;;  %s2279_s25 = sld [smem:[#allocation24_spill]] }
 0x454   : > { %v920_v39 = vpop.f32.mrb[12].mxu1 }
 0x455   : > { %v927_v40 = vmul.f32 %v1549_v38, %v920_v39  ;;  %v1408_v41 = vpop.f32.mrb[13].mxu1  ;;  %s2184_s23 = scalar_lea.hbm %s2279_s25, %s1330_s28 }
 0x456   : > { %v923_v42 = vpop.f32.mrb[14].mxu1 }
 0x457   : > { %1043 = vrot.lane.b32.xlu0 %v927_v40, %s1784_s20  ;;  %v1409_v43 = vpop.f32.mrb[15].mxu1  ;;  %s1672_s20 = scalar_lea.vmem %s2186_s9, 128 }
 0x458   : > { %p1673_p1 = scmp.ne.s32.totalorder %s2186_s9, %s1672_s20 }
 0x45a   : > { %p1674_p10 = pnand %p1673_p1, %p2280_p6 }
 0x45c   : > { %v1030_v44 = vpop.f32.mrb[16].mxu1  ;;  %p1675_p3 = pneg %p1674_p10 }
 0x45d   : > { %v1037_v45 = vmul.f32 %v1551_v0, %v1030_v44  ;;  %v1420_v46 = vpop.f32.mrb[17].mxu1 }
 0x45e   : > { %v1033_v47 = vpop.f32.mrb[18].mxu1 }
 0x45f   : > { %v1421_v48 = vpop.f32.mrb[19].mxu1  ;;  %1047 = vrot.lane.b32.xlu1 %v1037_v45, %s1785_s19  ;;  %s1678_s19 = scalar_lea.vmem %s1677_s13, 256 }
 0x460   : > { %p1680_p9 = scmp.lt.s32.totalorder %s1678_s19, %s1672_s20 }
 0x462   : > { %p1681_p5 = por %p1680_p9, %p1679_p4 }
 0x464   : > { %p1682_p7 = pnand %p1681_p5, %p1675_p3 }
 0x4c1   : > { %v1040_v51 = vpop.permute.xlu1 %1039 }
 0x4c2   : > { %v1050_v54 = vsel %vm598_vm2, %v706_v52, %v1040_v51 }
 0x4c9   : > { %v1044_v53 = vpop.permute.xlu0 %1043 }
 0x4ca   : > { %v1052_v55 = vsel %vm1051_vm4, %v1050_v54, %v1044_v53 }
 0x4d1   : > { %v1048_v56 = vpop.permute.xlu1 %1047 }
 0x4d2   : > { %v1054_v57 = vsel %vm1053_vm5, %v1052_v55, %v1048_v56 }
 0x4d3   : > { %v1055_v58 = vpack.c.bf16 %v1054_v57, %v1054_v57 }
 0x4d5   : > { %1427 = vmatmul.mubr.msk.bf16.vlgmr.msra.gmra.mrb[20].mxu0 %vm486_vm1, %v1055_v58 }
 0x5a8   : > { %v1116_v60 = vpop.f32.mrb[20].mxu0 }
 0x5a9   : > { %v1117_v61 = vadd.f32 %v1323_v59, %v1116_v60  ;;  %v1428_v62 = vpop.f32.mrb[21].mxu0 }
 0x5aa   : > { %v1119_v63 = vpop.f32.mrb[22].mxu0 }
 0x5ab   : > { %v1429_v1 = vpop.f32.mrb[23].mxu0  ;;  %v1122_v2 = vadd.f32 %v1117_v61, %v2085_v6  ;;  %v1327_v6 = vld [vmem:[%s2242_s8] ss:$0 sm:$0xff] }
 0x5ad   : > { %v1125_v3 = vsel %vm486_vm1, %v1122_v2, 0.0 }
 0x5ae   : > { %1126 = vadd.xlane.f32.xlu1 %v1125_v3 }
 0x63b   : > { %v1127_v4 = vpop.xlane.xlu1 %1126 }
 0x63c   : > { %v1129_v5 = vmul.f32 0.03125, %v1127_v4 }
 0x63e   : > { %v1130_v7 = vsub.f32 %v1122_v2, %v1129_v5 }
 0x640   : > { %v1131_v8 = vmul.f32 %v1130_v7, %v1130_v7 }
 0x642   : > { %v1132_v9 = vsel %vm486_vm1, %v1131_v8, 0.0 }
 0x643   : > { %1133 = vadd.xlane.f32.xlu0 %v1132_v9 }
 0x6d0   : > { %v1134_v10 = vpop.xlane.xlu0 %1133 }
 0x6d1   : > { %v1135_v11 = vmul.f32 0.03125, %v1134_v10 }
 0x6d3   : > { %v1136_v12 = vadd.f32 1e-05, %v1135_v11 }
 0x6d5   : > { %1554 = vrsqrt.f32 %v1136_v12 }
 0x6df   : > { %v1555_v13 = vpop.eup %1554 }
 0x6e0   : > { %v1138_v14 = vmul.f32 %v1555_v13, %v1130_v7 }
 0x6e2   : > { %v1145_v16 = vmul.f32 %v1327_v6, %v1138_v14 }
 0x6e4   : > { %v1152_v17 = vadd.f32 %v1328_v15, %v1145_v16 }
 0x6e6   : > { %1153 = vst.msk [vmem:[%s457_s27] sm:$0xff] %vm486_vm1, %v1152_v17 }
 0x6e7   : > { %1685 = shalt.err (!%p1682_p7)
}
 0x6e8   : > { %s1686_s2 = scalar_lea.hbm %s2184_s23, 128  ;;  %s1690_s30 = scalar_lea.hbm %s2279_s25, 256 }
 0x6e9   : > { %p1687_p13 = scmp.ne.s32.totalorder %s2184_s23, %s1686_s2  ;;  %p1691_p2 = scmp.lt.u32.totalorder %s2184_s23, %s2279_s25 }
 0x6ea   : > { %p1692_p12 = scmp.lt.u32.totalorder %s1690_s30, %s1686_s2  ;;  %p1694_p1 = scmp.lt.u32.totalorder %s1686_s2, %s2184_s23 }
 0x6eb   : > { %p1688_p8 = pnand %p1687_p13, %p2280_p6 }
 0x6ec   : > { %p1693_p0 = por %p1692_p12, %p1691_p2 }
 0x6ed   : > { %p1689_p11 = pneg %p1688_p8 }
 0x6ee   : > { %p1695_p10 = por %p1694_p1, %p1693_p0 }
 0x6f0   : > { %p1696_p3 = pnand %p1695_p10, %p1689_p11 }
 0x6f2   : > { %1699 = shalt.err (!%p1696_p3)
}
 0x6f3   : > { %1442 = dma.vmem_to_hbm [thread:$0]  (%p2280_p6), %s2186_s9, 128, %s2184_s23, %s1155_s10  }
 0x6f4 PF: > { %s2281_s22 = sld [smem:[#allocation16_spill]]  ;;  %s2282_s17 = sld [smem:[#allocation18_spill]] }
 0x6f5   : > { %p2284_p9 = scmp.ge.s32.totalorder %s1766_s18, 2 }
 0x6fa   : > { %s1181_s28 = sand.u32 1, %s2281_s22   ;;  %p2283_p4 = scmp.ne.s32.totalorder %s2282_s17, 0 }
 0x6fb   : > { %s1182_s27 = scalar_lea.sflag [#allocation4], %s1181_s28 }
 0x6fc   : > { %p1459_p5 = pnand %p2284_p9, %p2283_p4 }
 0x6fe   : > { %1741 = dma.done.wait (!%p1459_p5), %s1182_s27, 128  }
 0x6ff   : > { %1743 = vsyncadd (!%p1459_p5), %s1182_s27, 4294967168  ;;  %s30_s18 = sadd.s32 1, %s1766_s18   ;;  %s2285_s26 = sld [smem:[#allocation20_spill]] }
 0x700   : > { %p27_p7 = scmp.ge.s32.totalorder %s30_s18, 4   ;;  %s2286_s16 = sld [smem:[#allocation17_spill]] }
 0x701   : > { %s2287_s17 = sld [smem:[#allocation19_spill]]  ;;  %s2288_s13 = smov %s1750_s14 }
 0x702   : > { %s2289_s14 = smov %s1754_s15  ;;  %29 = sbr.rel (!%p27_p7) target bundleno = 14 (0xe), region = 126 }
 0x705   : > { %s2290_s15 = smov %s2285_s26 }
 0x709   :  { %1187 = vsyncpa [#allocation3], 1 }
 0x70a   :  { %1189 = vsyncpa [#allocation3 + $0x1], 1 }
 0x70b   :  { %1190 = vsyncpa [#allocation6], 1 }
 0x70c   :  { %1192 = vsyncpa [#allocation6 + $0x1], 1 }
 0x70d   :  { %1193 = vsyncpa [#allocation9], 1 }
 0x70e   :  { %1194 = vsyncpa [#allocation4], 1 }
 0x70f   :  { %1196 = vsyncpa [#allocation4 + $0x1], 1 }

</bundles_post_ra>
